<compile_context>
chip_gen: v7x
topology: tpu7x:2x2x1
jax: 0.10.0
libtpu: 0.0.40
codegen_flags: <defaults>
</compile_context>

<pallas_src>
import functools

import jax
import jax.numpy as jnp
from jax.experimental import pallas as pl
from jax.experimental.pallas import tpu as pltpu


_ROW_TILE_CAP = 8192  # allow 4k-8k row tiles when C is small/medium


def _detect_vmem_budget_and_limit():
    """Generation-aware VMEM sizing.

    Returns (tile_budget_bytes, vmem_limit_bytes).  The tile budget is compared
    against an estimate that already includes the double-buffered input tiles
    AND the in-kernel f32 temporaries, so it can sit fairly close to the scoped
    limit.  128-MiB chips (v5e/v6e) get a much larger budget than 64-MiB v7x.
    """
    phys = None
    try:
        info = pltpu.get_tpu_info()
        for name in ("vmem_capacity_bytes", "vmem_size_bytes", "vmem_bytes"):
            v = getattr(info, name, None)
            if isinstance(v, int) and v > 0:
                phys = v
                break
    except Exception:
        phys = None
    if phys is None:
        try:
            kind = jax.devices()[0].device_kind.lower()
            if "v7" in kind:
                phys = 64 << 20
            elif ("v6" in kind) or ("v5" in kind):
                phys = 128 << 20
        except Exception:
            phys = None
    if phys is None:
        phys = 64 << 20  # conservative: assume the smallest-VMEM generation
    if phys >= (128 << 20):           # v5e / v6e
        return 48 << 20, 96 << 20
    return 28 << 20, 48 << 20         # v7x: 64 MiB physical, keep headroom


def _round_up(x, m):
    return ((x + m - 1) // m) * m


def _split_full_batch(n):
    # When one tile would cover the whole batch, still emit >= 2 row tiles so
    # the "parallel" grid axis can be sharded across both v7x TensorCores.
    if n >= 16:
        return _round_up((n + 1) // 2, 8)
    return n


def _pick_tile_n(n, per_row_bytes, budget):
    rows = budget // max(per_row_bytes, 1)
    tile = min(_ROW_TILE_CAP, (rows // 8) * 8)
    tile = max(tile, 8)
    if tile >= n:
        return _split_full_batch(n)
    return tile


def _normalize_tile_n(tile_n, n):
    tile_n = min(int(tile_n), n)
    if tile_n < n:
        tile_n = max(8, (tile_n // 8) * 8)  # multiple of 8 unless full-batch
    return tile_n


def _write_tile_sum(out_ref, tile_sum):
    # Lane-dense (1, 8, 128) store of the tile's scalar partial sum
    # (replicated; wrapper reads [:, 0, 0]).  No masked (1, 1) stores.
    out_ref[...] = jnp.full(out_ref.shape, tile_sum, dtype=out_ref.dtype)


def _row_mask(per_row, tile_idx, tile_n, n_rows):
    # Mask padded tail rows of the last (partial) row tile.
    row_ids = tile_idx * tile_n + jax.lax.broadcasted_iota(
        jnp.int32, per_row.shape, 0)
    return jnp.where(row_ids < n_rows, per_row, 0.0)


# --------------------------------------------------------------------------
# Path 1: whole class axis in one block (small / medium C)
# --------------------------------------------------------------------------

def _cmce_soft_kernel(x_ref, t_ref, out_ref, *, n_rows, tile_n):
    """Soft targets: partial_i = sum_{rows in tile} sum_c -t*log_softmax(x)."""
    i = pl.program_id(0)

    x = x_ref[...]                                   # native dtype, no f32 copy
    m = jnp.max(x, axis=1, keepdims=True)            # exact in bf16
    z = (x - m).astype(jnp.float32)                  # promote only shifted logits
    lse = jnp.log(jnp.sum(jnp.exp(z), axis=1, keepdims=True))   # (tile_n, 1)

    t = t_ref[...].astype(jnp.float32)
    # sum_c -t*(z - lse) == lse*sum_c(t) - sum_c(t*z): saves a whole-tile sub.
    per_row = (lse * jnp.sum(t, axis=1, keepdims=True)
               - jnp.sum(t * z, axis=1, keepdims=True))

    _write_tile_sum(out_ref, jnp.sum(_row_mask(per_row, i, tile_n, n_rows)))


def _cmce_hard_kernel(x_ref, idx_ref, out_ref, *, n_rows, tile_n):
    """Hard (class-index) targets without materializing a one-hot matrix.

    Note: out-of-range indices silently contribute per_row = lse (no fault),
    unlike PyTorch which would error.
    """
    i = pl.program_id(0)

    x = x_ref[...]
    m = jnp.max(x, axis=1, keepdims=True)
    z = (x - m).astype(jnp.float32)
    lse = jnp.log(jnp.sum(jnp.exp(z), axis=1, keepdims=True))   # (tile_n, 1)

    idx = idx_ref[...]                                          # (tile_n, 1) i32
    col = jax.lax.broadcasted_iota(jnp.int32, z.shape, 1)
    z_at_tgt = jnp.sum(jnp.where(col == idx, z, 0.0), axis=1, keepdims=True)
    per_row = lse - z_at_tgt

    _write_tile_sum(out_ref, jnp.sum(_row_mask(per_row, i, tile_n, n_rows)))


# --------------------------------------------------------------------------
# Path 2: class-tiled (flash-style online softmax) for vocab-sized C
# --------------------------------------------------------------------------

def _cmce_soft_kernel_ctiled(x_ref, t_ref, out_ref,
                             m_scr, l_scr, ts_scr, tx_scr,
                             *, n_rows, n_cols, tile_n, tile_c):
    i = pl.program_id(0)
    j = pl.program_id(1)

    @pl.when(j == 0)
    def _():
        m_scr[...] = jnp.full_like(m_scr, -jnp.inf)
        l_scr[...] = jnp.zeros_like(l_scr)
        ts_scr[...] = jnp.zeros_like(ts_scr)
        tx_scr[...] = jnp.zeros_like(tx_scr)

    xf = x_ref[...].astype(jnp.float32)
    col = j * tile_c + jax.lax.broadcasted_iota(jnp.int32, xf.shape, 1)
    col_ok = col < n_cols                       # mask padded class-tail columns

    xm = jnp.where(col_ok, xf, -jnp.inf)
    m_old = m_scr[...]
    m_new = jnp.maximum(m_old, jnp.max(xm, axis=1, keepdims=True))
    l_scr[...] = (jnp.exp(m_old - m_new) * l_scr[...]
                  + jnp.sum(jnp.exp(xm - m_new), axis=1, keepdims=True))
    m_scr[...] = m_new

    tf = t_ref[...].astype(jnp.float32)
    ts_scr[...] += jnp.sum(jnp.where(col_ok, tf, 0.0), axis=1, keepdims=True)
    tx_scr[...] += jnp.sum(jnp.where(col_ok, tf * xf, 0.0), axis=1, keepdims=True)

    @pl.when(j == pl.num_programs(1) - 1)
    def _():
        lse = m_scr[...] + jnp.log(l_scr[...])
        per_row = lse * ts_scr[...] - tx_scr[...]
        _write_tile_sum(out_ref, jnp.sum(_row_mask(per_row, i, tile_n, n_rows)))


def _cmce_hard_kernel_ctiled(x_ref, idx_ref, out_ref,
                             m_scr, l_scr, xt_scr,
                             *, n_rows, n_cols, tile_n, tile_c):
    i = pl.program_id(0)
    j = pl.program_id(1)

    @pl.when(j == 0)
    def _():
        m_scr[...] = jnp.full_like(m_scr, -jnp.inf)
        l_scr[...] = jnp.zeros_like(l_scr)
        xt_scr[...] = jnp.zeros_like(xt_scr)

    xf = x_ref[...].astype(jnp.float32)
    col = j * tile_c + jax.lax.broadcasted_iota(jnp.int32, xf.shape, 1)
    col_ok = col < n_cols

    xm = jnp.where(col_ok, xf, -jnp.inf)
    m_old = m_scr[...]
    m_new = jnp.maximum(m_old, jnp.max(xm, axis=1, keepdims=True))
    l_scr[...] = (jnp.exp(m_old - m_new) * l_scr[...]
                  + jnp.sum(jnp.exp(xm - m_new), axis=1, keepdims=True))
    m_scr[...] = m_new

    idx = idx_ref[...]                                          # (tile_n, 1) i32
    hit = jnp.logical_and(col == idx, col_ok)
    xt_scr[...] += jnp.sum(jnp.where(hit, xf, 0.0), axis=1, keepdims=True)

    @pl.when(j == pl.num_programs(1) - 1)
    def _():
        per_row = (m_scr[...] + jnp.log(l_scr[...])) - xt_scr[...]
        _write_tile_sum(out_ref, jnp.sum(_row_mask(per_row, i, tile_n, n_rows)))


# --------------------------------------------------------------------------
# Wrapper
# --------------------------------------------------------------------------

def cutmix_cross_entropy_loss(logits, target, size_average=True, *,
                              tile_n=None, tile_c=None):
    """JAX/Pallas equivalent of CutMixCrossEntropyLoss.forward.

    logits: (N, C); target: (N, C) soft labels or (N,) int class indices.
    """
    n, c = logits.shape
    hard = target.ndim == 1
    budget, vmem_limit = _detect_vmem_budget_and_limit()

    li = jnp.dtype(logits.dtype).itemsize
    if hard:
        # Stream int32 class indices; the one-hot is never materialized.
        tgt = target.astype(jnp.int32).reshape(n, 1)
        ti = 0
        tgt_row_bytes = 128 * 4   # (tile_n, 1) i32 pads to 128 lanes in VMEM
    else:
        tgt = target              # native dtype in HBM; promoted in-kernel
        ti = jnp.dtype(tgt.dtype).itemsize
        tgt_row_bytes = c * ti

    # Per-row VMEM cost for a full-C tile: double-buffered inputs plus roughly
    # three live (tile_n, C) f32 temporaries inside the kernel.
    per_row_full = 2 * (c * li + tgt_row_bytes) + 3 * c * 4

    # --- decide whether the class axis needs tiling -----------------------
    use_ctile = False
    if tile_c is not None:
        tile_c = max(128, (int(tile_c) // 128) * 128)
        use_ctile = tile_c < c
    elif budget // per_row_full < 128:
        # vocab-sized C: a full-C block would force tiny row tiles (or blow
        # VMEM, worst on v7x's 64 MiB); tile the class axis instead.
        use_ctile = True

    partials = None
    if use_ctile:
        if tile_n is None:
            tile_n = 256 if n > 256 else _split_full_batch(n)
        tile_n = _normalize_tile_n(tile_n, n)

        n_scr = 3 if hard else 4
        if tile_c is None:
            unit = tile_n * (2 * (li + ti) + 12)        # per class column
            fixed = n_scr * tile_n * 128 * 4            # scratch columns
            if hard:
                fixed += 2 * tile_n * 128 * 4           # buffered idx block
            tile_c = max(128, ((budget - fixed) // max(unit, 1) // 128) * 128)
        tile_c = min(tile_c, max(128, (c // 128) * 128))

        if tile_c < c:
            num_tiles_n = pl.cdiv(n, tile_n)
            num_tiles_c = pl.cdiv(c, tile_c)

            if hard:
                kern = functools.partial(_cmce_hard_kernel_ctiled, n_rows=n,
                                         n_cols=c, tile_n=tile_n, tile_c=tile_c)
                in_specs = [
                    pl.BlockSpec((tile_n, tile_c), lambda i, j: (i, j)),
                    pl.BlockSpec((tile_n, 1), lambda i, j: (i, 0)),
                ]
            else:
                kern = functools.partial(_cmce_soft_kernel_ctiled, n_rows=n,
                                         n_cols=c, tile_n=tile_n, tile_c=tile_c)
                in_specs = [
                    pl.BlockSpec((tile_n, tile_c), lambda i, j: (i, j)),
                    pl.BlockSpec((tile_n, tile_c), lambda i, j: (i, j)),
                ]
            scratch = [pltpu.VMEM((tile_n, 1), jnp.float32)] * n_scr

            partials = pl.pallas_call(
                kern,
                out_shape=jax.ShapeDtypeStruct((num_tiles_n, 8, 128),
                                               jnp.float32),
                grid_spec=pltpu.PrefetchScalarGridSpec(
                    num_scalar_prefetch=0,
                    grid=(num_tiles_n, num_tiles_c),
                    in_specs=in_specs,
                    out_specs=pl.BlockSpec((1, 8, 128), lambda i, j: (i, 0, 0)),
                    scratch_shapes=scratch,
                ),
                compiler_params=pltpu.CompilerParams(
                    # rows are independent ("parallel", v7x megacore); the
                    # class axis is a reduction -> last + "arbitrary".
                    dimension_semantics=("parallel", "arbitrary"),
                    vmem_limit_bytes=vmem_limit,
                ),
            )(logits, tgt)
        # else: the (possibly clamped) class tile covers all of C -> fall
        # through to the simpler full-C path below.

    if partials is None:
        if tile_n is None:
            tile_n = _pick_tile_n(n, per_row_full, budget)
        tile_n = _normalize_tile_n(tile_n, n)
        num_tiles = pl.cdiv(n, tile_n)

        kern = functools.partial(
            _cmce_hard_kernel if hard else _cmce_soft_kernel,
            n_rows=n, tile_n=tile_n)
        t_block = (tile_n, 1) if hard else (tile_n, c)

        partials = pl.pallas_call(
            kern,
            out_shape=jax.ShapeDtypeStruct((num_tiles, 8, 128), jnp.float32),
            grid_spec=pltpu.PrefetchScalarGridSpec(
                num_scalar_prefetch=0,
                grid=(num_tiles,),
                in_specs=[
                    pl.BlockSpec((tile_n, c), lambda i: (i, 0)),
                    pl.BlockSpec(t_block, lambda i: (i, 0)),
                ],
                out_specs=pl.BlockSpec((1, 8, 128), lambda i: (i, 0, 0)),
            ),
            compiler_params=pltpu.CompilerParams(
                dimension_semantics=("parallel",),
                vmem_limit_bytes=vmem_limit,
            ),
        )(logits, tgt)

    loss_sum = jnp.sum(partials[:, 0, 0])
    if size_average:
        return loss_sum / jnp.float32(n)
    return loss_sum


if __name__ == "__main__":
    key = jax.random.PRNGKey(0)
    k1, k2, k3, k4, k5, k6 = jax.random.split(key, 6)

    N, C = 16, 32
    logits = jax.random.normal(k1, (N, C), dtype=jnp.float32)
    logp = jax.nn.log_softmax(logits, axis=1)

    # 1) soft-target case (default tiling -> exercises the >=2-tile split)
    raw = jax.random.uniform(k2, (N, C), dtype=jnp.float32)
    soft_target = raw / jnp.sum(raw, axis=1, keepdims=True)
    loss_soft = jax.block_until_ready(
        cutmix_cross_entropy_loss(logits, soft_target, size_average=True))
    ref_soft = jnp.mean(jnp.sum(-soft_target * logp, axis=1))
    assert jnp.allclose(loss_soft, ref_soft, atol=1e-4), (loss_soft, ref_soft)

    # 2) hard (class-index) target case -> index path, no one-hot in HBM
    hard_target = jax.random.randint(k3, (N,), 0, C)
    loss_hard = jax.block_until_ready(
        cutmix_cross_entropy_loss(logits, hard_target, size_average=True))
    ref_hard = jnp.mean(jnp.sum(-jax.nn.one_hot(hard_target, C) * logp, axis=1))
    assert jnp.allclose(loss_hard, ref_hard, atol=1e-4), (loss_hard, ref_hard)

    # 3) size_average=False (sum reduction)
    loss_sum = jax.block_until_ready(
        cutmix_cross_entropy_loss(logits, soft_target, size_average=False))
    ref_sum = jnp.sum(jnp.sum(-soft_target * logp, axis=1))
    assert jnp.allclose(loss_sum, ref_sum, atol=1e-3), (loss_sum, ref_sum)

    # 4) ragged batch with explicit small tile -> exercises tail-row masking
    N2 = 20
    logits2 = jax.random.normal(k4, (N2, C), dtype=jnp.float32)
    hard2 = jax.random.randint(k3, (N2,), 0, C)
    loss_ragged = jax.block_until_ready(
        cutmix_cross_entropy_loss(logits2, hard2, size_average=True, tile_n=8))
    logp2 = jax.nn.log_softmax(logits2, axis=1)
    ref_ragged = jnp.mean(jnp.sum(-jax.nn.one_hot(hard2, C) * logp2, axis=1))
    assert jnp.allclose(loss_ragged, ref_ragged, atol=1e-4), (loss_ragged, ref_ragged)

    # 5) bf16 logits stay bf16 in HBM; only z = x - m is promoted in-kernel
    logits_bf16 = logits.astype(jnp.bfloat16)
    loss_bf16 = jax.block_until_ready(
        cutmix_cross_entropy_loss(logits_bf16, soft_target, size_average=True))
    ref_bf16 = jnp.mean(jnp.sum(
        -soft_target * jax.nn.log_softmax(logits_bf16.astype(jnp.float32), axis=1),
        axis=1))
    assert jnp.allclose(loss_bf16, ref_bf16, atol=5e-2), (loss_bf16, ref_bf16)

    # 6) class-tiled (online-softmax) path, forced with small tiles:
    #    ragged rows (N3=22) AND ragged classes (C3=300 not a multiple of 128)
    N3, C3 = 22, 300
    logits3 = jax.random.normal(k5, (N3, C3), dtype=jnp.float32)
    raw3 = jax.random.uniform(k6, (N3, C3), dtype=jnp.float32)
    soft3 = raw3 / jnp.sum(raw3, axis=1, keepdims=True)
    hard3 = jax.random.randint(k6, (N3,), 0, C3)
    logp3 = jax.nn.log_softmax(logits3, axis=1)

    loss_ct_soft = jax.block_until_ready(
        cutmix_cross_entropy_loss(logits3, soft3, size_average=True,
                                  tile_n=8, tile_c=128))
    ref_ct_soft = jnp.mean(jnp.sum(-soft3 * logp3, axis=1))
    assert jnp.allclose(loss_ct_soft, ref_ct_soft, atol=1e-4), (loss_ct_soft, ref_ct_soft)

    loss_ct_hard = jax.block_until_ready(
        cutmix_cross_entropy_loss(logits3, hard3, size_average=True,
                                  tile_n=8, tile_c=128))
    ref_ct_hard = jnp.mean(jnp.sum(-jax.nn.one_hot(hard3, C3) * logp3, axis=1))
    assert jnp.allclose(loss_ct_hard, ref_ct_hard, atol=1e-4), (loss_ct_hard, ref_ct_hard)

    print("KERNEL_OK")
</pallas_src>

<mosaic_0001>
module attributes {stable_mosaic.version = 11 : i64} {
  func.func @_cmce_soft_kernel(%arg0: i32, %arg1: memref<8x32xf32, #tpu.memory_space<vmem>>, %arg2: memref<8x32xf32, #tpu.memory_space<vmem>>, %arg3: memref<1x8x128xf32, #tpu.memory_space<vmem>>) attributes {dimension_semantics = [#tpu.dimension_semantics<parallel>], iteration_bounds = array<i64: 2>, scalar_prefetch = 0 : i64, scratch_operands = 0 : i64, tpu.core_type = #tpu.core_type<tc>, window_params = [{transform_indices = @transform_0, window_bounds = array<i64: 8, 32>}, {transform_indices = @transform_1, window_bounds = array<i64: 8, 32>}, {transform_indices = @transform_2, window_bounds = array<i64: 1, 8, 128>}]} {
    %c0 = arith.constant 0 : index
    %c0_0 = arith.constant 0 : index
    %0 = vector.load %arg1[%c0, %c0_0] : memref<8x32xf32, #tpu.memory_space<vmem>>, vector<8x32xf32>
    %cst = arith.constant dense<0xFF800000> : vector<8xf32>
    %1 = vector.multi_reduction <maximumf>, %0, %cst [1] : vector<8x32xf32> to vector<8xf32>
    %2 = vector.shape_cast %1 : vector<8xf32> to vector<8x1xf32>
    %3 = vector.broadcast %2 : vector<8x1xf32> to vector<8x32xf32>
    %4 = arith.subf %0, %3 : vector<8x32xf32>
    %5 = math.exp %4 : vector<8x32xf32>
    %cst_1 = arith.constant dense<0.000000e+00> : vector<8xf32>
    %6 = vector.multi_reduction <add>, %5, %cst_1 [1] : vector<8x32xf32> to vector<8xf32>
    %7 = vector.shape_cast %6 : vector<8xf32> to vector<8x1xf32>
    %8 = math.log %7 : vector<8x1xf32>
    %c0_2 = arith.constant 0 : index
    %c0_3 = arith.constant 0 : index
    %9 = vector.load %arg2[%c0_2, %c0_3] : memref<8x32xf32, #tpu.memory_space<vmem>>, vector<8x32xf32>
    %cst_4 = arith.constant dense<0.000000e+00> : vector<8xf32>
    %10 = vector.multi_reduction <add>, %9, %cst_4 [1] : vector<8x32xf32> to vector<8xf32>
    %11 = vector.shape_cast %10 : vector<8xf32> to vector<8x1xf32>
    %12 = arith.mulf %8, %11 : vector<8x1xf32>
    %13 = arith.mulf %9, %4 : vector<8x32xf32>
    %cst_5 = arith.constant dense<0.000000e+00> : vector<8xf32>
    %14 = vector.multi_reduction <add>, %13, %cst_5 [1] : vector<8x32xf32> to vector<8xf32>
    %15 = vector.shape_cast %14 : vector<8xf32> to vector<8x1xf32>
    %16 = arith.subf %12, %15 : vector<8x1xf32>
    %c8_i32 = arith.constant 8 : i32
    %17 = arith.muli %arg0, %c8_i32 : i32
    %18 = tpu.iota {dimensions = array<i32: 0>} : vector<8x1xi32>
    %19 = vector.broadcast %17 : i32 to vector<8x1xi32>
    %20 = arith.addi %19, %18 : vector<8x1xi32>
    %c16_i32 = arith.constant 16 : i32
    %21 = vector.broadcast %c16_i32 : i32 to vector<8x1xi32>
    %22 = arith.cmpi slt, %20, %21 : vector<8x1xi32>
    %cst_6 = arith.constant 0.000000e+00 : f32
    %23 = vector.broadcast %cst_6 : f32 to vector<8x1xf32>
    %24 = arith.select %22, %16, %23 : vector<8x1xi1>, vector<8x1xf32>
    %25 = vector.shape_cast %24 : vector<8x1xf32> to vector<1x8x1xf32>
    %cst_7 = arith.constant dense<0.000000e+00> : vector<1xf32>
    %26 = vector.multi_reduction <add>, %25, %cst_7 [1, 2] : vector<1x8x1xf32> to vector<1xf32>
    %27 = vector.shape_cast %26 : vector<1xf32> to vector<1x1x1xf32>
    %28 = vector.extract %27[0, 0, 0] : f32 from vector<1x1x1xf32>
    %29 = vector.broadcast %28 : f32 to vector<1x8x128xf32>
    %c0_8 = arith.constant 0 : index
    %c0_9 = arith.constant 0 : index
    %c0_10 = arith.constant 0 : index
    %30 = vector.load %arg3[%c0_8, %c0_9, %c0_10] : memref<1x8x128xf32, #tpu.memory_space<vmem>>, vector<1x8x128xf32>
    tpu.vector_store %arg3[%c0_8, %c0_9, %c0_10], %29 {strides = array<i32>} : memref<1x8x128xf32, #tpu.memory_space<vmem>>, vector<1x8x128xf32>,
    return
  }
  func.func @transform_0(%arg0: i32) -> (i32, i32) {
    %c0_i32 = arith.constant 0 : i32
    %c0_i32_0 = arith.constant 0 : i32
    return %arg0, %c0_i32 : i32, i32
  }
  func.func @transform_1(%arg0: i32) -> (i32, i32) {
    %c0_i32 = arith.constant 0 : i32
    %c0_i32_0 = arith.constant 0 : i32
    return %arg0, %c0_i32 : i32, i32
  }
  func.func @transform_2(%arg0: i32) -> (i32, i32, i32) {
    %c0_i32 = arith.constant 0 : i32
    %c0_i32_0 = arith.constant 0 : i32
    %c0_i32_1 = arith.constant 0 : i32
    return %arg0, %c0_i32, %c0_i32_0 : i32, i32, i32
  }
}

</mosaic_0001>

<bundles_post_ra>
// kernel: tpu_custom_call.1
= control target key start
LH: loop header
LB: loop body
LE: loop exit
PB: predicated region body
PF: predicated region fallthrough
CT: control target
= control target key end

     0   :  { %7 = vsyncpa [#allocation3], 0  ;;  %s784_s0 = inlined_call_operand.hbm [shape: f32[16,32], index: 0, kind: input, shape index: {}]   ;;  %s785_s1 = inlined_call_operand.hbm [shape: f32[16,32], index: 1, kind: input, shape index: {}]   ;;  %s786_s2 = inlined_call_operand.hbm [shape: f32[2,8,128], index: 2, kind: output, shape index: {}]  }
   0x1   :  { %9 = vsyncpa [#allocation3 + $0x1], 0 }
   0x2   :  { %10 = vsyncpa [#allocation6], 0 }
   0x3   :  { %12 = vsyncpa [#allocation6 + $0x1], 0 }
   0x4   :  { %13 = vsyncpa [#allocation4], 0 }
   0x5   :  { %15 = vsyncpa [#allocation4 + $0x1], 0  ;;  %s569_s9 = smov 0   ;;  %s571_s10 = smov 0  }
   0x6   :  { %s573_s11 = smov 0   ;;  %s575_s12 = smov 0  }
   0x7 LB: > { %s590_s13 = sadd.s32 4294967295, %s549_s12   ;;  %s346_s14 = sadd.s32 4294967294, %s549_s12   ;;  %s549_s12 = sphi %s575_s12, %s805_s12   ;;  %s545_s11 = sphi %s573_s11, %s804_s11   ;;  %s541_s10 = sphi %s571_s10, %s803_s10   ;;  %s537_s9 = sphi %s569_s9, %s802_s9  }
   0x8   : > { %s594_s15 = sadd.s32 1, %s549_s12   ;;  %s28_s16 = sadd.s32 1, %s545_s11 }
   0x9   : > { %s25_s17 = ssub.s32 %s549_s12, %s594_s15  ;;  %p35_p0 = scmp.ne.s32.totalorder %s545_s11, %s541_s10 }
   0xa   : > { %p26_p1 = scmp.eq.s32.totalorder %s25_s17, 0  ;;  %p36_p2 = scmp.eq.s32.totalorder %s549_s12, 0 }
   0xb   : > { %p41_p3 = scmp.ne.s32.totalorder %s541_s10, %s537_s9  ;;  %p42_p4 = scmp.eq.s32.totalorder %s590_s13, 0 }
   0xc   : > { %s606_s18 = scalar_select %p26_p1, %s545_s11, %s28_s16  }
   0xd   : > { %p608_p5 = por %p36_p2, %p35_p0  ;;  %p612_p6 = por %p42_p4, %p41_p3 }
   0xe   : > { %p91_p7 = scmp.eq.s32.totalorder %s590_s13, 1  ;;  %p97_p8 = scmp.eq.s32.totalorder %s346_s14, 1 }
   0xf   : > { %s790_s20 = scalar_select %p612_p6, 1, 0 }
  0x10   : > { %p381_p10 = scmp.lt.s32.totalorder %s549_s12, 2  ;;  %p619_p11 = por %p91_p7, %p35_p0 }
  0x11   : > { %p623_p12 = por %p97_p8, %p41_p3  ;;  %s628_s23 = sand.u32 1, %s545_s11  }
  0x12   : > { %s791_s21 = scalar_select %p619_p11, 1, 0 }
  0x13   : > { %s792_s22 = scalar_select %p623_p12, 1, 0 }
  0x14   : > { %s350_s24 = sshll.u32 %s549_s12, 7  ;;  %s349_s25 = sshll.u32 %s628_s23, 3 }
  0x15   : > { %s637_s28 = scalar_lea.hbm %s784_s0, %s350_s24  ;;  %s121_s29 = scalar_lea.vmem [#allocation2], %s349_s25 }
  0x16   : > { %s128_s30 = sshll.u32 %s121_s29, 4  ;;  %p643_p13 = pnand %p381_p10, %p608_p5  ;;  %s647_s30 = int_to_ptr.vmem [resolvable:$true] %s128_s30 }
  0x17   : > { %s118_s4 = scalar_lea.sflag [#allocation3], %s628_s23  ;;  %s419_s5 = scalar_lea.hbm %s637_s28, 128 }
  0x18   : > { %p420_p2 = scmp.ne.s32.totalorder %s637_s28, %s419_s5  ;;  %p421_p3 = pneg %p643_p13 }
  0x19   : > { %s424_s8 = scalar_lea.hbm %s784_s0, 256  ;;  %p425_p5 = scmp.lt.u32.totalorder %s637_s28, %s784_s0 }
  0x1a   : > { %p422_p4 = pnand %p421_p3, %p420_p2  ;;  %p426_p8 = scmp.lt.u32.totalorder %s424_s8, %s419_s5 }
  0x1b   : > { %p428_p9 = scmp.lt.u32.totalorder %s419_s5, %s637_s28 }
  0x1c   : > { %p423_p7 = pneg %p422_p4  ;;  %p427_p10 = por %p426_p8, %p425_p5 }
  0x1e   : > { %p429_p0 = por %p428_p9, %p427_p10 }
  0x20   : > { %p430_p1 = pnand %p429_p0, %p423_p7 }
  0x22   : > { %433 = shalt.err (!%p430_p1)
}
  0x23   : > { %s434_s17 = scalar_lea.vmem %s647_s30, 128  ;;  %s551_s19 = smov [#allocation2]  }
  0x24   : > { %p435_p2 = scmp.ne.s32.totalorder %s647_s30, %s434_s17  ;;  %s439_s26 = sshll.u32 %s551_s19, 4  ;;  %s440_s26 = int_to_ptr.vmem [resolvable:$false] %s439_s26 }
  0x25   : > { %s441_s27 = scalar_lea.vmem %s440_s26, 256  ;;  %p442_p11 = scmp.lt.s32.totalorder %s647_s30, %s440_s26 }
  0x26   : > { %p437_p4 = pnand %p435_p2, %p421_p3  ;;  %p443_p5 = scmp.lt.s32.totalorder %s441_s27, %s434_s17 }
  0x28   : > { %p438_p12 = pneg %p437_p4  ;;  %p444_p8 = por %p443_p5, %p442_p11 }
  0x2a   : > { %p445_p9 = pnand %p444_p8, %p438_p12 }
  0x2c   : > { %448 = shalt.err (!%p445_p9)
}
  0x2d   : > { %373 = dma.hbm_to_vmem [thread:$0]  (!%p643_p13), %s637_s28, 128, %s647_s30, %s118_s4  }
  0x2e   : > { %p794_p0 = scmp.lt.s32.totalorder %s549_s12, 3  ;;  %p795_p1 = scmp.ge.s32.totalorder %s549_s12, 1 }
  0x2f   : > { %s690_s7 = scalar_lea.hbm %s785_s1, %s350_s24  ;;  %s139_s8 = scalar_lea.vmem [#allocation5], %s349_s25 }
  0x30   : > { %p681_p7 = pnand %p795_p1, %p794_p0  ;;  %s146_s14 = sshll.u32 %s139_s8, 4  ;;  %s147_s14 = int_to_ptr.vmem [resolvable:$true] %s146_s14 }
  0x31   : > { %s136_s28 = scalar_lea.sflag [#allocation6], %s628_s23  ;;  %s449_s30 = scalar_lea.hbm %s690_s7, 128 }
  0x32   : > { %s796_s29 = scalar_select %p681_p7, 1, 0 }
  0x33   : > { %p450_p11 = scmp.ne.s32.totalorder %s690_s7, %s449_s30  ;;  %s454_s24 = scalar_lea.hbm %s785_s1, 256 }
  0x34   : > { %p455_p2 = scmp.lt.u32.totalorder %s690_s7, %s785_s1  ;;  %p456_p4 = scmp.lt.u32.totalorder %s454_s24, %s449_s30 }
  0x35   : > { %p452_p12 = pnand %p450_p11, %p421_p3  ;;  %p458_p8 = scmp.lt.u32.totalorder %s449_s30, %s690_s7 }
  0x36   : > { %p457_p5 = por %p456_p4, %p455_p2 }
  0x37   : > { %p453_p10 = pneg %p452_p12 }
  0x38   : > { %p459_p9 = por %p458_p8, %p457_p5 }
  0x3a   : > { %p460_p0 = pnand %p459_p9, %p453_p10 }
  0x3c   : > { %463 = shalt.err (!%p460_p0)
}
  0x3d   : > { %s464_s23 = scalar_lea.vmem %s147_s14, 128  ;;  %s552_s25 = smov [#allocation5]  }
  0x3e   : > { %p465_p1 = scmp.ne.s32.totalorder %s147_s14, %s464_s23  ;;  %s469_s26 = sshll.u32 %s552_s25, 4  ;;  %s470_s26 = int_to_ptr.vmem [resolvable:$false] %s469_s26 }
  0x3f   : > { %s471_s27 = scalar_lea.vmem %s470_s26, 256  ;;  %p472_p6 = scmp.lt.s32.totalorder %s147_s14, %s470_s26 }
  0x40   : > { %p467_p11 = pnand %p465_p1, %p421_p3  ;;  %p473_p7 = scmp.lt.s32.totalorder %s471_s27, %s464_s23 }
  0x42   : > { %p468_p12 = pneg %p467_p11  ;;  %p474_p2 = por %p473_p7, %p472_p6 }
  0x44   : > { %p475_p4 = pnand %p474_p2, %p468_p12 }
  0x46   : > { %478 = shalt.err (!%p475_p4)
}
  0x47   : > { %376 = dma.hbm_to_vmem [thread:$0]  (!%p643_p13), %s690_s7, 128, %s147_s14, %s136_s28  }
  0x48   : > { %p797_p10 = scmp.ne.s32.totalorder %s796_s29, 0 }
  0x49   : > { %s717_s5 = sand.u32 (!%p797_p10), 1, %s541_s10   ;;  %p798_p6 = scmp.ne.s32.totalorder (!%p797_p10), %s790_s20, 0 }
  0x4a   : > { %155 = sbr.rel (%p797_p10) target bundleno = 624 (0x270), region = 28  ;;  %s720_s6 = sshll.u32 (!%p797_p10), %s717_s5, 3 }
  0x4b   : > { %s158_s8 = scalar_lea.sflag (!%p797_p10), [#allocation3], %s717_s5  ;;  %s161_s30 = scalar_lea.vmem (!%p797_p10), [#allocation2], %s720_s6 }
  0x51   : > { %524 = dma.done.wait (%p798_p6), %s158_s8, 128  }
  0x52   : > { %526 = vsyncadd (%p798_p6), %s158_s8, 4294967168  ;;  %s167_s3 = scalar_lea.sflag [#allocation6], %s717_s5  ;;  %s170_s29 = scalar_lea.vmem [#allocation5], %s720_s6 }
  0x53   : > { %528 = dma.done.wait (%p798_p6), %s167_s3, 128  }
  0x54   : > { %530 = vsyncadd (%p798_p6), %s167_s3, 4294967168  ;;  %vm197_vm0 = vcmask 261120   ;;  %v196_v0 = vld [vmem:[%s161_s30] sm:$0xff]  ;;  %v209_v2 = vld [vmem:[%s170_s29] sm:$0xff]  ;;  %v220_v12 = vlaneseq  ;;  %s357_s20 = sshll.u32 %s590_s13, 3  ;;  %vm226_vm2 = vcmask 7168  }
  0x55   : > { %v198_v1 = vsel %vm197_vm0, %v196_v0, -inf  ;;  %v210_v3 = vsel %vm197_vm0, %v209_v2, 0.0  ;;  %v222_v14 = vstv %s357_s20  ;;  %s195_s7 = scalar_lea.vmem [#allocation7], %s720_s6  ;;  %s359_s28 = sshll.u32 %s590_s13, 7 }
  0x56   : > { %199 = vmax.xlane.f32.xlu0 %v198_v1  ;;  %211 = vadd.xlane.f32.xlu1 %v210_v3  ;;  %v221_v13 = vshrl.u32 %v220_v12, 7  ;;  %s253_s14 = sshll.u32 %s195_s7, 4  ;;  %s742_s17 = scalar_lea.hbm %s786_s2, %s359_s28  ;;  %s737_s14 = int_to_ptr.vmem [resolvable:$true] %s253_s14 }
  0x57   : > { %s240_s19 = scalar_lea.sflag [#allocation4], %s717_s5  ;;  %s479_s23 = scalar_lea.vmem %s737_s14, 128 }
  0x58   : > { %v223_v17 = vadd.s32 %v222_v14, %v221_v13  ;;  %p480_p13 = scmp.ne.s32.totalorder %s737_s14, %s479_s23  ;;  %p799_p3 = scmp.ne.s32.totalorder %s791_s21, 0 }
  0x59   : > { %s553_s13 = smov [#allocation7]  }
  0x5a   : > { %vm224_vm1 = vcmp.lt.s32.totalorder %v223_v17, 16  ;;  %p481_p7 = pnand %p480_p13, %p799_p3  ;;  %s483_s25 = sshll.u32 %s553_s13, 4  ;;  %s484_s25 = int_to_ptr.vmem [resolvable:$false] %s483_s25 }
  0x5b   : > { %s485_s26 = scalar_lea.vmem %s484_s25, 256  ;;  %p486_p8 = scmp.lt.s32.totalorder %s737_s14, %s484_s25 }
  0x5c   : > { %p482_p5 = pneg %p481_p7  ;;  %p487_p9 = scmp.lt.s32.totalorder %s485_s26, %s479_s23 }
  0x5e   : > { %p488_p0 = por %p487_p9, %p486_p8 }
  0x60   : > { %p489_p1 = pnand %p488_p0, %p482_p5 }
  0xe3   : > { %v200_v4 = vpop.xlane.xlu0 %199  ;;  %v212_v15 = vpop.xlane.xlu1 %211 }
  0xe4   : > { %v201_v5 = vsub.f32 %v196_v0, %v200_v4 }
  0xe6   : > { %v202_v6 = vmul.f32 1.442695, %v201_v5  ;;  %v214_v7 = vmul.f32 %v209_v2, %v201_v5 }
  0xe8   : > { %415 = vpow2.f32 %v202_v6  ;;  %v215_v8 = vsel %vm197_vm0, %v214_v7, 0.0 }
  0xe9   : > { %216 = vadd.xlane.f32.xlu1 %v215_v8 }
  0xf2   : > { %v416_v9 = vpop.eup %415 }
  0xf3   : > { %v204_v10 = vsel %vm197_vm0, %v416_v9, 0.0 }
  0xf4   : > { %205 = vadd.xlane.f32.xlu0 %v204_v10 }
 0x176   : > { %v217_v20 = vpop.xlane.xlu1 %216 }
 0x181   : > { %v206_v11 = vpop.xlane.xlu0 %205 }
 0x182   : > { %417 = vlog2.f32 %v206_v11 }
 0x18c   : > { %v418_v16 = vpop.eup %417 }
 0x18d   : > { %v208_v18 = vmul.f32 0.6931472, %v418_v16 }
 0x18f   : > { %v213_v19 = vmul.f32 %v212_v15, %v208_v18 }
 0x191   : > { %v218_v21 = vsub.f32 %v213_v19, %v217_v20 }
 0x193   : > { %v225_v22 = vsel %vm224_vm1, %v218_v21, 0.0 }
 0x194   : > { %v227_v23 = vsel %vm226_vm2, %v225_v22, 0.0 }
 0x195   : > { %228 = vadd.xlane.f32.xlu0 %v227_v23 }
 0x222   : > { %v229_v24 = vpop.xlane.xlu0 %228 }
 0x223   : > { %v230_v25 = vrot.slane %v229_v24, 4 }
 0x225   : > { %v231_v26 = vadd.f32 %v230_v25, %v229_v24 }
 0x227   : > { %v232_v27 = vrot.slane %v231_v26, 2 }
 0x229   : > { %v233_v28 = vadd.f32 %v232_v27, %v231_v26 }
 0x22b   : > { %v234_v29 = vrot.slane %v233_v28, 1 }
 0x22d   : > { %v235_v30 = vadd.f32 %v234_v29, %v233_v28 }
 0x22f   : > { %362 = vpush %v235_v30 }
 0x260   : > { %s363_s4 = spop %362 }
 0x261   : > { %v237_v31 = vstv %s363_s4 }
 0x262   : > { %238 = vst [vmem:[%s195_s7] sm:$0xff] %v237_v31 }
 0x263   : > { %492 = shalt.err (!%p489_p1)
}
 0x264   : > { %s493_s27 = scalar_lea.hbm %s742_s17, 128  ;;  %s497_s8 = scalar_lea.hbm %s786_s2, 256 }
 0x265   : > { %p494_p11 = scmp.ne.s32.totalorder %s742_s17, %s493_s27  ;;  %p498_p4 = scmp.lt.u32.totalorder %s742_s17, %s786_s2 }
 0x266   : > { %p499_p10 = scmp.lt.u32.totalorder %s497_s8, %s493_s27  ;;  %p501_p13 = scmp.lt.u32.totalorder %s493_s27, %s742_s17 }
 0x267   : > { %p495_p12 = pnand %p494_p11, %p799_p3 }
 0x268   : > { %p500_p6 = por %p499_p10, %p498_p4 }
 0x269   : > { %p496_p2 = pneg %p495_p12 }
 0x26a   : > { %p502_p7 = por %p501_p13, %p500_p6 }
 0x26c   : > { %p503_p5 = pnand %p502_p7, %p496_p2 }
 0x26e   : > { %506 = shalt.err (!%p503_p5)
}
 0x26f   : > { %368 = dma.vmem_to_hbm [thread:$0]  (%p799_p3), %s737_s14, 128, %s742_s17, %s240_s19  }
 0x270 PF: > { %s265_s29 = sand.u32 1, %s537_s9   ;;  %p800_p8 = scmp.ne.s32.totalorder %s792_s22, 0 }
 0x271   : > { %p801_p9 = scmp.ge.s32.totalorder %s549_s12, 2  ;;  %s266_s20 = scalar_lea.sflag [#allocation4], %s265_s29 }
 0x273   : > { %p378_p0 = pnand %p801_p9, %p800_p8 }
 0x275   : > { %532 = dma.done.wait (!%p378_p0), %s266_s20, 128  }
 0x276   : > { %534 = vsyncadd (!%p378_p0), %s266_s20, 4294967168  ;;  %p18_p1 = scmp.ge.s32.totalorder %s594_s15, 4   ;;  %s802_s9 = smov %s541_s10 }
 0x277   : > { %s803_s10 = smov %s545_s11  ;;  %s804_s11 = smov %s606_s18 }
 0x278   : > { %s805_s12 = smov %s594_s15  ;;  %20 = sbr.rel (!%p18_p1) target bundleno = 7 (0x7), region = 86 }
 0x27f   :  { %271 = vsyncpa [#allocation3], 1 }
 0x280   :  { %273 = vsyncpa [#allocation3 + $0x1], 1 }
 0x281   :  { %274 = vsyncpa [#allocation6], 1 }
 0x282   :  { %276 = vsyncpa [#allocation6 + $0x1], 1 }
 0x283   :  { %277 = vsyncpa [#allocation4], 1 }
 0x284   :  { %279 = vsyncpa [#allocation4 + $0x1], 1 }

</bundles_post_ra>
